<compile_context>
chip_gen: v6e
topology: v6e:2x2x1
jax: 0.10.0
libtpu: 0.0.40
codegen_flags: <defaults>
</compile_context>

<pallas_src>
import jax
import jax.numpy as jnp
from jax import lax
from jax.experimental import pallas as pl
from jax.experimental.pallas import tpu as pltpu


def _leaky_relu(x, slope=0.2):
    # single VALU max per element instead of compare + select
    return jnp.maximum(x, slope * x)


def _l2_normalize(x, eps=1e-12):
    # F.normalize(x, p=2, dim=-1): x / max(||x||, eps) == x * rsqrt(max(||x||^2, eps^2))
    ss = jnp.sum(x * x, axis=-1, keepdims=True)
    return x * lax.rsqrt(jnp.maximum(ss, eps * eps))


def _generator_kernel_nofb(z_ref, c_ref, w1z_ref, w1c_ref, b1_ref, w3_ref, b3_ref,
                           o_ref):
    cd = w1z_ref.dtype  # compute dtype of the MXU operands (bf16 by default)
    h1 = (jnp.dot(z_ref[...].astype(cd), w1z_ref[...],
                  preferred_element_type=jnp.float32)
          + jnp.dot(c_ref[...].astype(cd), w1c_ref[...],
                    preferred_element_type=jnp.float32)
          + b1_ref[...])
    h1 = _leaky_relu(h1)
    # TODO(synk): the PyTorch module also stashes x1 as `self.out` for the
    # feedback loop; add a second output BlockSpec for h1 if downstream needs it.
    h2 = jnp.dot(h1.astype(cd), w3_ref[...],
                 preferred_element_type=jnp.float32) + b3_ref[...]
    o_ref[...] = _l2_normalize(h2).astype(o_ref.dtype)


def _generator_kernel_fb(a1_ref, z_ref, c_ref, fb_ref, w1z_ref, w1c_ref, b1_ref,
                         w3_ref, b3_ref, o_ref):
    cd = w1z_ref.dtype
    h1 = (jnp.dot(z_ref[...].astype(cd), w1z_ref[...],
                  preferred_element_type=jnp.float32)
          + jnp.dot(c_ref[...].astype(cd), w1c_ref[...],
                    preferred_element_type=jnp.float32)
          + b1_ref[...])
    h1 = _leaky_relu(h1)
    # feedback injection in f32; a1 is a runtime SMEM scalar (sreg read, free)
    h = h1 + a1_ref[0, 0] * fb_ref[...].astype(jnp.float32)
    h2 = jnp.dot(h.astype(cd), w3_ref[...],
                 preferred_element_type=jnp.float32) + b3_ref[...]
    o_ref[...] = _l2_normalize(h2).astype(o_ref.dtype)


def _round_up(n, m):
    return ((n + m - 1) // m) * m


def _choose_tile_m(batch):
    # B <= 32: one grid step with the whole (8-aligned) batch.
    # 32 < B <= 1024: split into >= 2 grid steps so v7x's two TensorCores both
    #   get work (the batch axis is marked "parallel"); no effect on v5e/v6e.
    # B > 1024: 512-row tiles (near HBM roofline, per-step overhead amortized).
    if batch <= 32:
        return _round_up(batch, 8)
    if batch <= 1024:
        return _round_up(pl.cdiv(batch, 2), 8)
    return 512


def generator_forward(z, c, w1, b1, w3, b3, *, a1=None, feedback_layers=None,
                      compute_dtype=jnp.bfloat16, out_dtype=None):
    """TFVAEGAN Generator forward.

    z: (B, latent_size), c: (B, attSize)
    w1: (latent_size+attSize, layer_sizes[0]), b1: (1, layer_sizes[0]) or (layer_sizes[0],)
    w3: (layer_sizes[0], layer_sizes[1]),      b3: (1, layer_sizes[1]) or (layer_sizes[1],)
    feedback_layers: optional (B, layer_sizes[0]); a1: scalar feedback weight.
    out_dtype: set to jnp.bfloat16 to halve output DMA if downstream accepts it.
    """
    B, latent = z.shape
    att = c.shape[1]
    in_dim, h0 = w1.shape
    out_dim = w3.shape[1]
    assert in_dim == latent + att, (in_dim, latent, att)
    out_dtype = z.dtype if out_dtype is None else out_dtype

    tile_m = _choose_tile_m(B)
    grid = (pl.cdiv(B, tile_m),)

    # Split fc1's weight so concat(z, c) @ W1 == z @ W1[:latent] + c @ W1[latent:].
    # Keeps x = concat(z, c) entirely off HBM (no wrapper concat/cast/pad ops).
    w1z = w1[:latent].astype(compute_dtype)
    w1c = w1[latent:].astype(compute_dtype)
    w3c = w3.astype(compute_dtype)
    b1f = b1.reshape(1, -1).astype(jnp.float32)
    b3f = b3.reshape(1, -1).astype(jnp.float32)

    z_spec = pl.BlockSpec((tile_m, latent), lambda i: (i, 0))
    c_spec = pl.BlockSpec((tile_m, att), lambda i: (i, 0))
    # Constant-index (resident) weight/bias blocks. Tiny at these sizes.
    # TODO(synk): if layer sizes grow (>~2048 in bf16), single-buffer these
    # resident blocks and/or K/N-tile with a VMEM f32 accumulator to stay
    # within v7x's 64 MiB VMEM.
    w1z_spec = pl.BlockSpec((latent, h0), lambda i: (0, 0))
    w1c_spec = pl.BlockSpec((att, h0), lambda i: (0, 0))
    b1_spec = pl.BlockSpec((1, h0), lambda i: (0, 0))
    w3_spec = pl.BlockSpec((h0, out_dim), lambda i: (0, 0))
    b3_spec = pl.BlockSpec((1, out_dim), lambda i: (0, 0))
    o_spec = pl.BlockSpec((tile_m, out_dim), lambda i: (i, 0))

    if feedback_layers is None:
        kernel = _generator_kernel_nofb
        in_specs = [z_spec, c_spec, w1z_spec, w1c_spec, b1_spec, w3_spec, b3_spec]
        args = (z, c, w1z, w1c, b1f, w3c, b3f)
    else:
        kernel = _generator_kernel_fb
        # a1 as a runtime SMEM scalar -> no recompile per hyperparameter value.
        a1_arr = jnp.asarray(a1, dtype=jnp.float32).reshape(1, 1)
        a1_spec = pl.BlockSpec(memory_space=pltpu.MemorySpace.SMEM)
        fb_spec = pl.BlockSpec((tile_m, h0), lambda i: (i, 0))
        in_specs = [a1_spec, z_spec, c_spec, fb_spec,
                    w1z_spec, w1c_spec, b1_spec, w3_spec, b3_spec]
        args = (a1_arr, z, c, feedback_layers, w1z, w1c, b1f, w3c, b3f)

    out = pl.pallas_call(
        kernel,
        out_shape=jax.ShapeDtypeStruct((B, out_dim), out_dtype),
        grid_spec=pltpu.PrefetchScalarGridSpec(
            num_scalar_prefetch=0,
            grid=grid,
            in_specs=in_specs,
            out_specs=o_spec,
        ),
        compiler_params=pltpu.CompilerParams(
            dimension_semantics=("parallel",),
        ),
    )(*args)
    return out


def init_generator_params(key, input_size, layer_sizes):
    """weights_init: Linear weight ~ N(0, 0.02), bias = 0 (PyTorch (out,in) -> transposed)."""
    k1, k2 = jax.random.split(key)
    w1_pt = 0.02 * jax.random.normal(k1, (layer_sizes[0], input_size), jnp.float32)
    w3_pt = 0.02 * jax.random.normal(k2, (layer_sizes[1], layer_sizes[0]), jnp.float32)
    b1 = jnp.zeros((1, layer_sizes[0]), jnp.float32)
    b3 = jnp.zeros((1, layer_sizes[1]), jnp.float32)
    return w1_pt.T, b1, w3_pt.T, b3


def generator_reference(z, c, w1, b1, w3, b3, *, a1=None, feedback_layers=None):
    x = jnp.concatenate([z, c], axis=-1)
    h1 = x @ w1 + b1.reshape(1, -1)
    h1 = jnp.maximum(h1, 0.2 * h1)
    if feedback_layers is not None:
        h1 = h1 + a1 * feedback_layers
    h2 = h1 @ w3 + b3.reshape(1, -1)
    norm = jnp.sqrt(jnp.sum(h2 * h2, axis=-1, keepdims=True))
    return h2 / jnp.maximum(norm, 1e-12)


if __name__ == "__main__":
    latent_size, att_size = 32, 32          # opt.latent_size, opt.attSize
    layer_sizes = [128, 256]                # opt.decoder_layer_sizes
    B = 16
    input_size = latent_size + att_size

    key = jax.random.PRNGKey(0)
    kz, kc, kp, kb1, kb3, kf = jax.random.split(key, 6)
    z = jax.random.normal(kz, (B, latent_size), dtype=jnp.float32)
    c = jax.random.normal(kc, (B, att_size), dtype=jnp.float32)
    w1, b1, w3, b3 = init_generator_params(kp, input_size, layer_sizes)
    # non-zero biases to exercise the bias-add path (weights_init would zero them)
    b1 = 0.1 * jax.random.normal(kb1, b1.shape, dtype=jnp.float32)
    b3 = 0.1 * jax.random.normal(kb3, b3.shape, dtype=jnp.float32)

    # --- path 1: plain forward (feedback_layers=None) ---
    out = generator_forward(z, c, w1, b1, w3, b3)
    out = jax.block_until_ready(out)
    ref = generator_reference(z, c, w1, b1, w3, b3)
    assert out.shape == (B, layer_sizes[1])
    assert jnp.allclose(out, ref, atol=1e-2, rtol=1e-2), \
        float(jnp.max(jnp.abs(out - ref)))

    # --- path 2: feedback forward ---
    fb = jax.random.normal(kf, (B, layer_sizes[0]), dtype=jnp.float32)
    a1 = 0.5
    out_fb = generator_forward(z, c, w1, b1, w3, b3, a1=a1, feedback_layers=fb)
    out_fb = jax.block_until_ready(out_fb)
    ref_fb = generator_reference(z, c, w1, b1, w3, b3, a1=a1, feedback_layers=fb)
    assert out_fb.shape == (B, layer_sizes[1])
    assert jnp.allclose(out_fb, ref_fb, atol=1e-2, rtol=1e-2), \
        float(jnp.max(jnp.abs(out_fb - ref_fb)))

    print("KERNEL_OK")
</pallas_src>

<mosaic_0001>
module attributes {stable_mosaic.version = 11 : i64} {
  func.func @_generator_kernel_nofb(%arg0: i32, %arg1: memref<16x32xf32, #tpu.memory_space<vmem>>, %arg2: memref<16x32xf32, #tpu.memory_space<vmem>>, %arg3: memref<32x128xbf16, #tpu.memory_space<vmem>>, %arg4: memref<32x128xbf16, #tpu.memory_space<vmem>>, %arg5: memref<1x128xf32, #tpu.memory_space<vmem>>, %arg6: memref<128x256xbf16, #tpu.memory_space<vmem>>, %arg7: memref<1x256xf32, #tpu.memory_space<vmem>>, %arg8: memref<16x256xf32, #tpu.memory_space<vmem>>) attributes {dimension_semantics = [#tpu.dimension_semantics<parallel>], iteration_bounds = array<i64: 1>, scalar_prefetch = 0 : i64, scratch_operands = 0 : i64, tpu.core_type = #tpu.core_type<tc>, window_params = [{transform_indices = @transform_0, window_bounds = array<i64: 16, 32>}, {transform_indices = @transform_1, window_bounds = array<i64: 16, 32>}, {pipeline_mode = #tpu.pipeline_mode<synchronous>, transform_indices = @transform_2, window_bounds = array<i64: 32, 128>}, {pipeline_mode = #tpu.pipeline_mode<synchronous>, transform_indices = @transform_3, window_bounds = array<i64: 32, 128>}, {pipeline_mode = #tpu.pipeline_mode<synchronous>, transform_indices = @transform_4, window_bounds = array<i64: 1, 128>}, {pipeline_mode = #tpu.pipeline_mode<synchronous>, transform_indices = @transform_5, window_bounds = array<i64: 128, 256>}, {pipeline_mode = #tpu.pipeline_mode<synchronous>, transform_indices = @transform_6, window_bounds = array<i64: 1, 256>}, {transform_indices = @transform_7, window_bounds = array<i64: 16, 256>}]} {
    %c0 = arith.constant 0 : index
    %c0_0 = arith.constant 0 : index
    %0 = vector.load %arg1[%c0, %c0_0] : memref<16x32xf32, #tpu.memory_space<vmem>>, vector<16x32xf32>
    %1 = arith.truncf %0 : vector<16x32xf32> to vector<16x32xbf16>
    %c0_1 = arith.constant 0 : index
    %c0_2 = arith.constant 0 : index
    %2 = vector.load %arg3[%c0_1, %c0_2] : memref<32x128xbf16, #tpu.memory_space<vmem>>, vector<32x128xbf16>
    %cst = arith.constant dense<0.000000e+00> : vector<16x128xf32>
    %3 = tpu.matmul %1, %2, %cst {dimension_numbers = #tpu.dot_dimension_numbers<[1], [0], [0], [1], [0, 0, 1, 1], [], []>} : vector<16x32xbf16>, vector<32x128xbf16>, vector<16x128xf32> -> vector<16x128xf32>
    %c0_3 = arith.constant 0 : index
    %c0_4 = arith.constant 0 : index
    %4 = vector.load %arg2[%c0_3, %c0_4] : memref<16x32xf32, #tpu.memory_space<vmem>>, vector<16x32xf32>
    %5 = arith.truncf %4 : vector<16x32xf32> to vector<16x32xbf16>
    %c0_5 = arith.constant 0 : index
    %c0_6 = arith.constant 0 : index
    %6 = vector.load %arg4[%c0_5, %c0_6] : memref<32x128xbf16, #tpu.memory_space<vmem>>, vector<32x128xbf16>
    %cst_7 = arith.constant dense<0.000000e+00> : vector<16x128xf32>
    %7 = tpu.matmul %5, %6, %cst_7 {dimension_numbers = #tpu.dot_dimension_numbers<[1], [0], [0], [1], [0, 0, 1, 1], [], []>} : vector<16x32xbf16>, vector<32x128xbf16>, vector<16x128xf32> -> vector<16x128xf32>
    %8 = arith.addf %3, %7 : vector<16x128xf32>
    %c0_8 = arith.constant 0 : index
    %c0_9 = arith.constant 0 : index
    %9 = vector.load %arg5[%c0_8, %c0_9] : memref<1x128xf32, #tpu.memory_space<vmem>>, vector<1x128xf32>
    %10 = vector.broadcast %9 : vector<1x128xf32> to vector<16x128xf32>
    %11 = arith.addf %8, %10 : vector<16x128xf32>
    %cst_10 = arith.constant 2.000000e-01 : f32
    %12 = vector.broadcast %cst_10 : f32 to vector<16x128xf32>
    %13 = arith.mulf %12, %11 : vector<16x128xf32>
    %14 = arith.maximumf %11, %13 : vector<16x128xf32>
    %15 = arith.truncf %14 : vector<16x128xf32> to vector<16x128xbf16>
    %c0_11 = arith.constant 0 : index
    %c0_12 = arith.constant 0 : index
    %16 = vector.load %arg6[%c0_11, %c0_12] : memref<128x256xbf16, #tpu.memory_space<vmem>>, vector<128x256xbf16>
    %cst_13 = arith.constant dense<0.000000e+00> : vector<16x256xf32>
    %17 = tpu.matmul %15, %16, %cst_13 {dimension_numbers = #tpu.dot_dimension_numbers<[1], [0], [0], [1], [0, 0, 1, 1], [], []>} : vector<16x128xbf16>, vector<128x256xbf16>, vector<16x256xf32> -> vector<16x256xf32>
    %c0_14 = arith.constant 0 : index
    %c0_15 = arith.constant 0 : index
    %18 = vector.load %arg7[%c0_14, %c0_15] : memref<1x256xf32, #tpu.memory_space<vmem>>, vector<1x256xf32>
    %19 = vector.broadcast %18 : vector<1x256xf32> to vector<16x256xf32>
    %20 = arith.addf %17, %19 : vector<16x256xf32>
    %21 = arith.mulf %20, %20 : vector<16x256xf32>
    %cst_16 = arith.constant dense<0.000000e+00> : vector<16xf32>
    %22 = vector.multi_reduction <add>, %21, %cst_16 [1] : vector<16x256xf32> to vector<16xf32>
    %23 = vector.shape_cast %22 : vector<16xf32> to vector<16x1xf32>
    %cst_17 = arith.constant 1.000000e-24 : f32
    %24 = vector.broadcast %cst_17 : f32 to vector<16x1xf32>
    %25 = arith.maximumf %23, %24 : vector<16x1xf32>
    %26 = math.rsqrt %25 : vector<16x1xf32>
    %27 = vector.broadcast %26 : vector<16x1xf32> to vector<16x256xf32>
    %28 = arith.mulf %20, %27 : vector<16x256xf32>
    %c0_18 = arith.constant 0 : index
    %c0_19 = arith.constant 0 : index
    %29 = vector.load %arg8[%c0_18, %c0_19] : memref<16x256xf32, #tpu.memory_space<vmem>>, vector<16x256xf32>
    tpu.vector_store %arg8[%c0_18, %c0_19], %28 {strides = array<i32>} : memref<16x256xf32, #tpu.memory_space<vmem>>, vector<16x256xf32>,
    return
  }
  func.func @transform_0(%arg0: i32) -> (i32, i32) {
    %c0_i32 = arith.constant 0 : i32
    %c0_i32_0 = arith.constant 0 : i32
    return %arg0, %c0_i32 : i32, i32
  }
  func.func @transform_1(%arg0: i32) -> (i32, i32) {
    %c0_i32 = arith.constant 0 : i32
    %c0_i32_0 = arith.constant 0 : i32
    return %arg0, %c0_i32 : i32, i32
  }
  func.func @transform_2(%arg0: i32) -> (i32, i32) {
    %c0_i32 = arith.constant 0 : i32
    %c0_i32_0 = arith.constant 0 : i32
    %c0_i32_1 = arith.constant 0 : i32
    return %c0_i32, %c0_i32_0 : i32, i32
  }
  func.func @transform_3(%arg0: i32) -> (i32, i32) {
    %c0_i32 = arith.constant 0 : i32
    %c0_i32_0 = arith.constant 0 : i32
    %c0_i32_1 = arith.constant 0 : i32
    return %c0_i32, %c0_i32_0 : i32, i32
  }
  func.func @transform_4(%arg0: i32) -> (i32, i32) {
    %c0_i32 = arith.constant 0 : i32
    %c0_i32_0 = arith.constant 0 : i32
    %c0_i32_1 = arith.constant 0 : i32
    return %c0_i32, %c0_i32_0 : i32, i32
  }
  func.func @transform_5(%arg0: i32) -> (i32, i32) {
    %c0_i32 = arith.constant 0 : i32
    %c0_i32_0 = arith.constant 0 : i32
    %c0_i32_1 = arith.constant 0 : i32
    return %c0_i32, %c0_i32_0 : i32, i32
  }
  func.func @transform_6(%arg0: i32) -> (i32, i32) {
    %c0_i32 = arith.constant 0 : i32
    %c0_i32_0 = arith.constant 0 : i32
    %c0_i32_1 = arith.constant 0 : i32
    return %c0_i32, %c0_i32_0 : i32, i32
  }
  func.func @transform_7(%arg0: i32) -> (i32, i32) {
    %c0_i32 = arith.constant 0 : i32
    %c0_i32_0 = arith.constant 0 : i32
    return %arg0, %c0_i32 : i32, i32
  }
}

</mosaic_0001>

<bundles_post_ra>
// kernel: tpu_custom_call.1
= control target key start
LH: loop header
LB: loop body
LE: loop exit
PB: predicated region body
PF: predicated region fallthrough
CT: control target
= control target key end

     0   :  { %12 = vsyncpa [#allocation3], 0  ;;  %s741_s0 = inlined_call_operand.hbm [shape: f32[16,32], index: 0, kind: input, shape index: {}]   ;;  %s742_s1 = inlined_call_operand.hbm [shape: f32[16,32], index: 1, kind: input, shape index: {}]   ;;  %s743_s2 = inlined_call_operand.hbm [shape: bf16[32,128], index: 2, kind: input, shape index: {}]   ;;  %s744_s3 = inlined_call_operand.hbm [shape: bf16[32,128], index: 3, kind: input, shape index: {}]   ;;  %s745_s4 = inlined_call_operand.vmem [shape: f32[1,128], index: 4, kind: input, shape index: {}]   ;;  %s746_s5 = inlined_call_operand.hbm [shape: bf16[128,256], index: 5, kind: input, shape index: {}]   ;;  %s747_s6 = inlined_call_operand.vmem [shape: f32[1,256], index: 6, kind: input, shape index: {}]   ;;  %s748_s7 = inlined_call_operand.hbm [shape: f32[16,256], index: 7, kind: output, shape index: {}]  }
   0x1   :  { %13 = vsyncpa [#allocation6], 0 }
   0x2   :  { %14 = vsyncpa [#allocation9], 0 }
   0x3   :  { %15 = vsyncpa [#allocation4], 0  ;;  %s649_s24 = smov [#allocation5]  }
   0x4   :  { %s33_s25 = sshll.u32 %s649_s24, 4  ;;  %s34_s25 = int_to_ptr.vmem [resolvable:$true] %s33_s25 }
   0x5   :  { %s529_s26 = scalar_lea.vmem %s34_s25, 256  ;;  %p534_p1 = scmp.lt.s32.totalorder %s34_s25, %s34_s25 }
   0x6   :  { %p530_p0 = scmp.ne.s32.totalorder %s34_s25, %s529_s26  ;;  %p535_p2 = scmp.lt.s32.totalorder %s529_s26, %s529_s26 }
   0x8   :  { %p536_p3 = por %p535_p2, %p534_p1 }
   0xa   :  { %p537_p4 = pnand %p536_p3, %p530_p0 }
   0xc   :  { %540 = shalt.err (!%p537_p4)
}
   0xd   :  { %s650_s27 = smov 128   ;;  %s651_s28 = smov 8  }
   0xe   :  { %39 = dma.hbm_to_vmem [thread:$0]  %s742_s1, 256, %s34_s25, [#allocation6], %s650_s27, %s650_s27, %s651_s28  }
   0xf   :  { %s652_s8 = smov [#allocation8]   ;;  %s653_s10 = smov [#allocation2]  }
  0x10   :  { %s57_s9 = sshll.u32 %s652_s8, 4  ;;  %s21_s11 = sshll.u32 %s653_s10, 4  ;;  %s58_s9 = int_to_ptr.vmem [resolvable:$true] %s57_s9  ;;  %s22_s11 = int_to_ptr.vmem [resolvable:$true] %s21_s11 }
  0x11   :  { %s549_s12 = scalar_lea.vmem %s58_s9, 256  ;;  %p554_p6 = scmp.lt.s32.totalorder %s58_s9, %s58_s9 }
  0x12   :  { %p550_p5 = scmp.ne.s32.totalorder %s58_s9, %s549_s12  ;;  %p555_p7 = scmp.lt.s32.totalorder %s549_s12, %s549_s12 }
  0x14   :  { %p556_p8 = por %p555_p7, %p554_p6 }
  0x16   :  { %p557_p9 = pnand %p556_p8, %p550_p5 }
  0x18   :  { %560 = shalt.err (!%p557_p9)
}
  0x19   :  { %s654_s13 = smov 64   ;;  %s655_s14 = smov 4  }
  0x1a   :  { %63 = dma.hbm_to_vmem [thread:$0]  %s744_s3, 256, %s58_s9, [#allocation9], %s654_s13, %s654_s13, %s655_s14  }
  0x1b   :  { %s569_s1 = scalar_lea.vmem %s22_s11, 256  ;;  %p574_p11 = scmp.lt.s32.totalorder %s22_s11, %s22_s11 }
  0x1c   :  { %p570_p10 = scmp.ne.s32.totalorder %s22_s11, %s569_s1  ;;  %p575_p12 = scmp.lt.s32.totalorder %s569_s1, %s569_s1 }
  0x1e   :  { %p576_p13 = por %p575_p12, %p574_p11 }
  0x20   :  { %p577_p0 = pnand %p576_p13, %p570_p10 }
  0x22   :  { %580 = shalt.err (!%p577_p0)
}
  0x23   :  { %27 = dma.hbm_to_vmem [thread:$0]  %s741_s0, 256, %s22_s11, [#allocation3], %s650_s27, %s650_s27, %s651_s28  }
  0x24   :  { %s656_s19 = smov [#allocation7]   ;;  %s657_s21 = smov [#allocation10]  }
  0x25   :  { %s45_s20 = sshll.u32 %s656_s19, 4  ;;  %s71_s3 = sshll.u32 %s657_s21, 4  ;;  %s46_s20 = int_to_ptr.vmem [resolvable:$true] %s45_s20  ;;  %s72_s3 = int_to_ptr.vmem [resolvable:$true] %s71_s3 }
  0x26   :  { %s589_s22 = scalar_lea.vmem %s46_s20, 256  ;;  %p594_p2 = scmp.lt.s32.totalorder %s46_s20, %s46_s20 }
  0x27   :  { %p590_p1 = scmp.ne.s32.totalorder %s46_s20, %s589_s22  ;;  %p595_p3 = scmp.lt.s32.totalorder %s589_s22, %s589_s22 }
  0x29   :  { %p596_p4 = por %p595_p3, %p594_p2 }
  0x2b   :  { %p597_p5 = pnand %p596_p4, %p590_p1 }
  0x2d   :  { %600 = shalt.err (!%p597_p5)
}
  0x2e   :  { %51 = dma.hbm_to_vmem [thread:$0]  %s743_s2, 256, %s46_s20, [#allocation6], %s654_s13, %s654_s13, %s655_s14  }
  0x2f   :  { %s609_s25 = scalar_lea.vmem %s72_s3, 2048  ;;  %p614_p7 = scmp.lt.s32.totalorder %s72_s3, %s72_s3 }
  0x30   :  { %p610_p6 = scmp.ne.s32.totalorder %s72_s3, %s609_s25  ;;  %p615_p8 = scmp.lt.s32.totalorder %s609_s25, %s609_s25 }
  0x32   :  { %p616_p9 = por %p615_p8, %p614_p7 }
  0x34   :  { %p617_p10 = pnand %p616_p9, %p610_p6 }
  0x36   :  { %620 = shalt.err (!%p617_p10)
}
  0x37   :  { %77 = dma.hbm_to_vmem [thread:$0]  %s746_s5, 2048, %s72_s3, [#allocation9], %s650_s27, %s650_s27, %s651_s28  }
  0x38   :  { %641 = dma.done.wait [#allocation3], 256  }
  0x39   :  { %642 = vsyncadd [#allocation3], 4294967040 }
  0x3a   :  { %643 = dma.done.wait [#allocation6], 512  }
  0x3b   :  { %644 = vsyncadd [#allocation6], 4294966784 }
  0x3c   :  { %645 = dma.done.wait [#allocation9], 2304  }
  0x3d   :  { %646 = vsyncadd [#allocation9], 4294964992  ;;  %v658_v0 = vmov 0.0   ;;  %vm659_vm0 = vmmov 0   ;;  %v489_v1 = vld [vmem:[#allocation8 + $0x8] sm:$0xff]   ;;  %v490_v2 = vld [vmem:[#allocation8] sm:$0xff]   ;;  %v255_v46 = vlaneseq }
  0x3e   :  { %458 = vmatprep.subr.bf16.mxu1 %v658_v0  ;;  %462 = vmatprep.mubr.msk.bf16.mxu1 %vm659_vm0, %v658_v0  ;;  %v103_v3 = vld [vmem:[#allocation5] sm:$0xff]  ;;  %v104_v4 = vld [vmem:[#allocation5 + $0x8] sm:$0xff]  ;;  %v491_v6 = vld [vmem:[#allocation7 + $0x8] sm:$0xff]   ;;  %vm122_vm1 = vcmask 261120   ;;  %v660_v27 = vmov 0  }
  0x3f   :  { %459 = vmatpush3.bf16.msra.mxu1 %v489_v1  ;;  %v105_v5 = vpack.c.bf16 %v104_v4, %v103_v3  ;;  %v493_v7 = vld [vmem:[#allocation10 + $0x74] ss:$8 sps:$4 sm:$0xff]   ;;  %v495_v8 = vld [vmem:[#allocation10 + $0x70] ss:$8 sps:$4 sm:$0xff]   ;;  %v496_v9 = vld [vmem:[#allocation10 + $0x64] ss:$8 sps:$4 sm:$0xff]   ;;  %377 = vmatprep.mubr.bf16.mxu0 %v660_v27 }
  0x40   :  { %460 = vmatprep.subr.bf16.mxu1 %v658_v0  ;;  %v498_v10 = vld [vmem:[#allocation10 + $0x60] ss:$8 sps:$4 sm:$0xff]   ;;  %345 = vmatprep.subr.bf16.mxu0 %v493_v7  ;;  %v499_v14 = vld [vmem:[#allocation10 + $0x54] ss:$8 sps:$4 sm:$0xff]   ;;  %v501_v16 = vld [vmem:[#allocation10 + $0x50] ss:$8 sps:$4 sm:$0xff]  }
  0x41   :  { %v492_v11 = vld [vmem:[#allocation7] sm:$0xff]   ;;  %v97_v13 = vld [vmem:[#allocation2 + $0x8] sm:$0xff]  ;;  %346 = vmatpush1.bf16.msra.mxu0 %v495_v8  ;;  %v505_v19 = vld [vmem:[#allocation10 + $0x34] ss:$8 sps:$4 sm:$0xff]   ;;  %v256_v47 = vshrl.u32 %v255_v46, 7 }
  0x42   :  { %v96_v12 = vld [vmem:[#allocation2] sm:$0xff]  ;;  %347 = vmatprep.subr.bf16.mxu0 %v496_v9  ;;  %v507_v20 = vld [vmem:[#allocation10 + $0x30] ss:$8 sps:$4 sm:$0xff]   ;;  %v511_v23 = vld [vmem:[#allocation10 + $0x14] ss:$8 sps:$4 sm:$0xff]  }
  0x43   :  { %461 = vmatpush3.bf16.msra.mxu1 %v490_v2  ;;  %v98_v15 = vpack.c.bf16 %v97_v13, %v96_v12  ;;  %v502_v17 = vld [vmem:[#allocation10 + $0x44] ss:$8 sps:$4 sm:$0xff]   ;;  %v504_v18 = vld [vmem:[#allocation10 + $0x40] ss:$8 sps:$4 sm:$0xff]   ;;  %v513_v24 = vld [vmem:[#allocation10 + $0x10] ss:$8 sps:$4 sm:$0xff]  }
  0x44   :  { %466 = vmatprep.subr.bf16.mxu1 %v658_v0  ;;  %v508_v21 = vld [vmem:[#allocation10 + $0x24] ss:$8 sps:$4 sm:$0xff]   ;;  %v510_v22 = vld [vmem:[#allocation10 + $0x20] ss:$8 sps:$4 sm:$0xff]   ;;  %v257_v48 = vsub.s32 0, %v256_v47  ;;  %v261_v50 = vsub.s32 1, %v256_v47 }
  0x45   :  { %348 = vmatpush1.bf16.msra.mxu0 %v498_v10  ;;  %v514_v25 = vld [vmem:[#allocation10 + $0x4] ss:$8 sps:$4 sm:$0xff]   ;;  %v516_v26 = vld [vmem:[#allocation10] ss:$8 sps:$4 sm:$0xff]  }
  0x46   :  { %463 = vmatmul.mubr.msk.bf16.vlgmr.msra.gmra.mxu1 %vm122_vm1, %v105_v5  ;;  %349 = vmatprep.subr.bf16.mxu0 %v499_v14  ;;  %v435_v33 = vld [vmem:[%s745_s4] ss:$0 sm:$0xff]  ;;  %s661_s4 = smov [#allocation11]  }
  0x47   :  { %467 = vmatpush3.bf16.msra.mxu1 %v491_v6  ;;  %470 = vmatprep.mubr.msk.bf16.mxu1 %vm659_vm0, %v658_v0  ;;  %v253_v49 = vld [vmem:[%s747_s6] sm:$0x3]  ;;  %s415_s6 = sshll.u32 %s661_s4, 4  ;;  %s416_s6 = int_to_ptr.vmem [resolvable:$true] %s415_s6 }
  0x48   :  { %468 = vmatprep.subr.bf16.mxu1 %v658_v0  ;;  %v258_v51 = vrot.slane %v253_v49, %v257_v48  ;;  %v262_v52 = vrot.slane %v253_v49, %v261_v50  ;;  %s621_s29 = scalar_lea.vmem %s416_s6, 512  ;;  %p626_p12 = scmp.lt.s32.totalorder %s416_s6, %s416_s6 }
  0x49   :  { %350 = vmatpush1.bf16.msra.mxu0 %v501_v16  ;;  %p622_p11 = scmp.ne.s32.totalorder %s416_s6, %s621_s29  ;;  %p627_p13 = scmp.lt.s32.totalorder %s621_s29, %s621_s29 }
  0x4a   :  { %351 = vmatprep.subr.bf16.mxu0 %v502_v17 }
  0x4b   :  { %469 = vmatpush3.bf16.msra.mxu1 %v492_v11  ;;  %p628_p0 = por %p627_p13, %p626_p12 }
  0x4d   :  { %352 = vmatpush1.bf16.msra.mxu0 %v504_v18  ;;  %p629_p1 = pnand %p628_p0, %p622_p11 }
  0x4e   :  { %471 = vmatmul.mubr.msk.bf16.vlgmr.msra.gmra.mxu1 %vm122_vm1, %v98_v15  ;;  %353 = vmatprep.subr.bf16.mxu0 %v505_v19 }
  0x51   :  { %354 = vmatpush1.bf16.msra.mxu0 %v507_v20 }
  0x52   :  { %355 = vmatprep.subr.bf16.mxu0 %v508_v21 }
  0x55   :  { %356 = vmatpush1.bf16.msra.mxu0 %v510_v22 }
  0x56   :  { %357 = vmatprep.subr.bf16.mxu0 %v511_v23 }
  0x59   :  { %358 = vmatpush1.bf16.msra.mxu0 %v513_v24 }
  0x5a   :  { %359 = vmatprep.subr.bf16.mxu0 %v514_v25 }
  0x5d   :  { %360 = vmatpush1.bf16.msra.mxu0 %v516_v26 }
 0x106   :  { %v160_v28 = vpop.f32.mrf.mxu1 }
 0x108   :  { %v464_v29 = vpop.f32.mrf.mxu1 }
 0x10a   :  { %v163_v30 = vpop.f32.mrf.mxu1 }
 0x10c   :  { %v465_v31 = vpop.f32.mrf.mxu1 }
 0x10e   :  { %v216_v32 = vpop.f32.mrf.mxu1 }
 0x10f   :  { %v217_v34 = vadd.f32 %v216_v32, %v160_v28 }
 0x110   :  { %v472_v35 = vpop.f32.mrf.mxu1 }
 0x111   :  { %v230_v36 = vadd.f32 %v435_v33, %v217_v34 }
 0x112   :  { %v219_v37 = vpop.f32.mrf.mxu1 }
 0x113   :  { %v220_v38 = vadd.f32 %v219_v37, %v163_v30  ;;  %v232_v40 = vmul.f32 0.2, %v230_v36 }
 0x114   :  { %v473_v39 = vpop.f32.mrf.mxu1 }
 0x115   :  { %v231_v41 = vadd.f32 %v435_v33, %v220_v38  ;;  %v234_v43 = vmax.f32 %v230_v36, %v232_v40 }
 0x117   :  { %v233_v42 = vmul.f32 0.2, %v231_v41 }
 0x119   :  { %v235_v44 = vmax.f32 %v231_v41, %v233_v42 }
 0x11b   :  { %v236_v45 = vpack.c.bf16 %v235_v44, %v234_v43 }
 0x11d   :  { %378 = vmatmul.mubr.bf16.vlgmr.msra.gmra.mxu0 %v236_v45 }
 0x1dd   :  { %v379_v53 = vpop.f32.mrf.mxu0 }
 0x1de   :  { %v380_v54 = vadd.f32 %v379_v53, %v258_v51 }
 0x1df   :  { %v381_v55 = vpop.f32.mrf.mxu0 }
 0x1e0   :  { %v382_v56 = vadd.f32 %v381_v55, %v262_v52  ;;  %v388_v59 = vmul.f32 %v380_v54, %v380_v54 }
 0x1e1   :  { %v383_v57 = vpop.f32.mrf.mxu0 }
 0x1e2   :  { %v384_v58 = vadd.f32 %v383_v57, %v258_v51  ;;  %v389_v60 = vmul.f32 %v382_v56, %v382_v56 }
 0x1e3   :  { %v385_v61 = vpop.f32.mrf.mxu0 }
 0x1e4   :  { %v386_v62 = vadd.f32 %v385_v61, %v262_v52  ;;  %v392_v63 = vadd.f32 %v389_v60, %v388_v59  ;;  %v390_v0 = vmul.f32 %v384_v58, %v384_v58 }
 0x1e6   :  { %v391_v1 = vmul.f32 %v386_v62, %v386_v62  ;;  %393 = vadd.xlane.f32.xlu0 %v392_v63 }
 0x1e8   :  { %v395_v2 = vadd.f32 %v391_v1, %v390_v0 }
 0x1ea   :  { %396 = vadd.xlane.f32.xlu0 %v395_v2 }
 0x26f   :  { %v394_v3 = vpop.xlane.xlu0 %393 }
 0x270   :  { %v398_v4 = vmax.f32 %v394_v3, 1e-24 }
 0x272   :  { %517 = vrsqrt.f32 %v398_v4 }
 0x273   :  { %v397_v5 = vpop.xlane.xlu0 %396 }
 0x274   :  { %v399_v6 = vmax.f32 %v397_v5, 1e-24 }
 0x276   :  { %519 = vrsqrt.f32 %v399_v6 }
 0x27f   :  { %v518_v7 = vpop.eup %517 }
 0x280   :  { %v402_v8 = vmul.f32 %v518_v7, %v380_v54  ;;  %v403_v9 = vmul.f32 %v518_v7, %v382_v56 }
 0x282   :  { %406 = vst [vmem:[#allocation11] sm:$0xff] %v402_v8  ;;  %407 = vst [vmem:[#allocation11 + $0x8] sm:$0xff] %v403_v9 }
 0x283   :  { %v520_v10 = vpop.eup %519 }
 0x284   :  { %v404_v11 = vmul.f32 %v520_v10, %v384_v58  ;;  %v405_v12 = vmul.f32 %v520_v10, %v386_v62 }
 0x286   :  { %408 = vst [vmem:[#allocation11 + $0x10] sm:$0xff] %v404_v11  ;;  %409 = vst [vmem:[#allocation11 + $0x18] sm:$0xff] %v405_v12 }
 0x287   :  { %632 = shalt.err (!%p629_p1)
}
 0x288   :  { %s662_s30 = smov 256   ;;  %s663_s8 = smov 16  }
 0x289   :  { %421 = dma.vmem_to_hbm [thread:$0]  %s416_s6, 512, %s748_s7, [#allocation4], %s662_s30, %s662_s30, %s663_s8  }
 0x28a   :  { %647 = dma.done.wait [#allocation4], 512  }
 0x28b   :  { %648 = vsyncadd [#allocation4], 4294966784 }
 0x28c   :  { %425 = vsyncpa [#allocation3], 1 }
 0x28d   :  { %426 = vsyncpa [#allocation6], 1 }
 0x28e   :  { %427 = vsyncpa [#allocation9], 1 }
 0x28f   :  { %428 = vsyncpa [#allocation4], 1 }

</bundles_post_ra>
